<compile_context>
chip_gen: v7x
topology: tpu7x:2x2x1
jax: 0.10.0
libtpu: 0.0.40
codegen_flags: <defaults>
</compile_context>

<pallas_src>
import functools
import math

import jax
import jax.numpy as jnp
from jax.experimental import pallas as pl
from jax.experimental.pallas import tpu as pltpu


# ----------------------------------------------------------------------------
# Host-side helpers: interpolation matrices, output-size logic, HW parameters.
# (PyTorch / torchvision semantics: align_corners=False, no antialias.)
# ----------------------------------------------------------------------------
@functools.lru_cache(maxsize=64)
def _bilinear_resize_matrix(in_size: int, out_size: int, dtype_name: str):
    """(out_size, in_size) bilinear interpolation matrix."""
    scale = in_size / out_size
    dst = jnp.arange(out_size, dtype=jnp.float32)
    src = jnp.clip((dst + 0.5) * scale - 0.5, 0.0, float(in_size - 1))
    i0 = jnp.floor(src).astype(jnp.int32)
    i1 = jnp.minimum(i0 + 1, in_size - 1)
    w1 = src - i0.astype(jnp.float32)
    w0 = 1.0 - w1
    rows = jnp.arange(out_size)
    m = jnp.zeros((out_size, in_size), jnp.float32)
    m = m.at[rows, i0].add(w0)
    m = m.at[rows, i1].add(w1)
    return m.astype(jnp.dtype(dtype_name))


def _compute_output_size(in_h, in_w, size, max_size=None):
    """Replicates torchvision TF.resize output-size logic."""
    if isinstance(size, (tuple, list)):
        if len(size) == 1:
            size = size[0]
        else:
            return int(size[0]), int(size[1])
    short, long_ = (in_h, in_w) if in_h <= in_w else (in_w, in_h)
    new_short, new_long = size, int(round(size * long_ / short))
    if max_size is not None and new_long > max_size:
        new_short = int(round(max_size * new_short / new_long))
        new_long = max_size
    if in_h <= in_w:
        return int(new_short), int(new_long)
    return int(new_long), int(new_short)


@functools.lru_cache(maxsize=1)
def _tpu_memory_params():
    """(num_tensorcores, plane-batch VMEM budget, vmem_limit cap) per generation."""
    vmem_cap = None
    try:
        info = pltpu.get_tpu_info()
        vmem_cap = int(getattr(info, "vmem_capacity_bytes", 0)) or None
    except Exception:
        vmem_cap = None
    if vmem_cap is None:
        vmem_cap = 64 * 2**20            # conservative default (v7x per-core)
    if vmem_cap <= 80 * 2**20:
        # v7x-like: 64 MiB VMEM per TensorCore, 2 TensorCores share the grid.
        return 2, 18 * 2**20, 40 * 2**20
    # v5e / v6e: 128 MiB VMEM, single TensorCore.
    return 1, 48 * 2**20, 80 * 2**20


def _sublane_multiple(dtype) -> int:
    """Second-minor block-dim granularity for a dtype (packed sublanes)."""
    return max(8, 32 // jnp.dtype(dtype).itemsize)


def _pick_plane_batch(p, cap, in_h, sub_in, out_h, sub_out) -> int:
    """Largest divisor of p <= cap whose slab blocks stay sublane-aligned."""
    cap = max(1, min(int(cap), p))
    for d in range(cap, 0, -1):
        if p % d:
            continue
        if (d * in_h) % sub_in == 0 and (d * out_h) % sub_out == 0:
            return d
    return p   # full-extent block (== full array dims) is always legal


# ----------------------------------------------------------------------------
# In-kernel dtype helpers.
# ----------------------------------------------------------------------------
def _to_compute(x, compute_dtype):
    if x.dtype == compute_dtype:
        return x
    if jnp.issubdtype(x.dtype, jnp.integer):
        # Route through int32: the most robust integer->float path on TPU.
        return x.astype(jnp.int32).astype(compute_dtype)
    return x.astype(compute_dtype)


def _to_output(r, out_dtype):
    out_dtype = jnp.dtype(out_dtype)
    if jnp.issubdtype(out_dtype, jnp.integer):
        info = jnp.iinfo(out_dtype)
        # floor(x + 0.5) == round-half-up; torchvision rounds its uint8 path.
        r = jnp.clip(jnp.floor(r + 0.5), float(info.min), float(info.max))
        return r.astype(jnp.int32).astype(out_dtype)
    return r.astype(out_dtype)


# ----------------------------------------------------------------------------
# Pallas kernels: b planes per grid step, two MXU matmuls over 2-D slabs.
# ----------------------------------------------------------------------------
def _resize_kernel_h_first(wh_ref, wwt_ref, x_ref, o_ref, t_ref, *,
                           b, in_h, out_h, compute_dtype):
    """Per-plane H-contraction into scratch, then one big W-contraction."""
    wh = wh_ref[...]                                       # (out_h, in_h)
    for q in range(b):                                     # short unrolled loop
        xq = _to_compute(x_ref[pl.ds(q * in_h, in_h), :], compute_dtype)
        t_ref[pl.ds(q * out_h, out_h), :] = jnp.dot(
            wh, xq, preferred_element_type=jnp.float32).astype(t_ref.dtype)
    # One big MXU matmul: (b*out_h, in_w) @ (in_w, out_w) -> output slab.
    r = jnp.dot(t_ref[...], wwt_ref[...], preferred_element_type=jnp.float32)
    o_ref[...] = _to_output(r, o_ref.dtype)


def _resize_kernel_w_first(wh_ref, wwt_ref, x_ref, o_ref, s_ref, *,
                           b, in_h, out_h, compute_dtype):
    """One big W-contraction into scratch, then per-plane H-contraction."""
    x = _to_compute(x_ref[...], compute_dtype)             # (b*in_h, in_w)
    s_ref[...] = jnp.dot(x, wwt_ref[...],
                         preferred_element_type=jnp.float32).astype(s_ref.dtype)
    wh = wh_ref[...]                                       # (out_h, in_h)
    for q in range(b):                                     # short unrolled loop
        r = jnp.dot(wh, s_ref[pl.ds(q * in_h, in_h), :],
                    preferred_element_type=jnp.float32)
        o_ref[pl.ds(q * out_h, out_h), :] = _to_output(r, o_ref.dtype)


# ----------------------------------------------------------------------------
# Driver.
# ----------------------------------------------------------------------------
def _resize_planes(planes, size, max_size=None):
    """planes: (p, in_h, in_w) -> (p, out_h, out_w), dtype preserved."""
    p, in_h, in_w = (int(s) for s in planes.shape)
    out_h, out_w = _compute_output_size(in_h, in_w, size, max_size)
    out_dtype = planes.dtype

    if p == 0:
        return jnp.zeros((0, out_h, out_w), out_dtype)
    if (out_h, out_w) == (in_h, in_w):
        return planes                                      # bilinear identity

    # Compute dtype: keep f32/bf16 inputs in their own dtype; integer inputs
    # are cast to f32 *inside* the kernel (narrow dtype streams through HBM).
    # TODO(synk): feeding bf16 operands to the MXU for f32 inputs (v5e speedup)
    # is skipped to keep f32 results inside tight tolerances.
    if planes.dtype in (jnp.bfloat16, jnp.float32):
        compute_dtype = planes.dtype
    else:
        compute_dtype = jnp.float32
    cbytes = jnp.dtype(compute_dtype).itemsize
    in_bytes = jnp.dtype(planes.dtype).itemsize
    out_bytes = jnp.dtype(out_dtype).itemsize

    # Contraction order: MXU-granule-padded MAC counts; tie-break on
    # intermediate size (smaller intermediate -> less VMEM).
    g = 128
    ru = lambda v: -(-v // g) * g
    cost_h_first = out_h * ru(in_h) * ru(in_w) + out_h * ru(in_w) * ru(out_w)
    cost_w_first = in_h * ru(in_w) * ru(out_w) + out_h * ru(in_h) * ru(out_w)
    h_first = (cost_h_first < cost_w_first or
               (cost_h_first == cost_w_first and out_h * in_w <= in_h * out_w))
    inter_rows = out_h if h_first else in_h
    inter_cols = in_w if h_first else out_w

    # ---- Plane batch b per grid step (generation-aware) ---------------------
    num_tc, b_budget, limit_cap = _tpu_memory_params()
    weight_bytes = (out_h * in_h + in_w * out_w) * cbytes
    cast_elems = in_h * in_w if planes.dtype != compute_dtype else 0
    f32_tmp_elems = (out_h * out_w) if h_first else (in_h * out_w)
    per_plane_bytes = (2 * in_h * in_w * in_bytes          # double-buffered input
                       + 2 * out_h * out_w * out_bytes     # double-buffered output
                       + inter_rows * inter_cols * cbytes  # scratch intermediate
                       + f32_tmp_elems * 4                 # transient f32 dot result
                       + cast_elems * cbytes)              # in-kernel upcast copy
    b_vmem = max(1, (b_budget - 2 * weight_bytes) // per_plane_bytes)

    # Grid-step targets: enough steps to keep the BlockSpec pipeline busy and
    # (on v7x) feed both TensorCores; when p is too small for both, prefer a
    # larger b (fewer ~0.35us per-step overheads) while still giving every
    # core at least one step.
    target_steps = 4 * num_tc
    if p >= 2 * target_steps:
        b_steps = max(1, p // target_steps)
    else:
        b_steps = max(1, p // num_tc)
    hard_cap = 64          # bounds the unrolled per-plane loop (compile time)
    b_cap = min(b_vmem, b_steps, hard_cap)
    b = _pick_plane_batch(p, b_cap, in_h, _sublane_multiple(planes.dtype),
                          out_h, _sublane_multiple(out_dtype))

    # Interpolation matrices; W_w pre-transposed on the host -> (in_w, out_w).
    # TODO(synk): for very large images a banded (2 taps/row) formulation with
    # scalar-prefetched band offsets would keep the kernel HBM-bound instead of
    # MXU-bound (matters most on v5e); dense matrices are kept for simplicity.
    w_h = _bilinear_resize_matrix(in_h, out_h, jnp.dtype(compute_dtype).name)
    w_w_t = _bilinear_resize_matrix(in_w, out_w, jnp.dtype(compute_dtype).name).T

    slab = planes.reshape(p * in_h, in_w)                  # free: same HBM layout

    if h_first:
        kernel = functools.partial(_resize_kernel_h_first, b=b, in_h=in_h,
                                   out_h=out_h, compute_dtype=compute_dtype)
        scratch = [pltpu.VMEM((b * out_h, in_w), compute_dtype)]
    else:
        kernel = functools.partial(_resize_kernel_w_first, b=b, in_h=in_h,
                                   out_h=out_h, compute_dtype=compute_dtype)
        scratch = [pltpu.VMEM((b * in_h, out_w), compute_dtype)]

    need = b * per_plane_bytes + 2 * weight_bytes + (1 << 20)
    vmem_limit = int(min(max(2 * need, 32 * 2**20), limit_cap))
    vmem_limit = int(max(vmem_limit, need))   # never under-provision our own need

    # TODO(synk): the constant-index weight inputs could be single-buffered
    # (pipeline_mode=pl.Buffered(1)) to save VMEM; left default-buffered (and
    # accounted at 2x in `need`) to keep top-level pallas_call lowering safe.
    out_slab = pl.pallas_call(
        kernel,
        out_shape=jax.ShapeDtypeStruct((p * out_h, out_w), out_dtype),
        grid_spec=pltpu.PrefetchScalarGridSpec(
            num_scalar_prefetch=0,
            grid=(p // b,),
            in_specs=[
                pl.BlockSpec((out_h, in_h), lambda i: (0, 0)),        # W_h
                pl.BlockSpec((in_w, out_w), lambda i: (0, 0)),        # W_w^T
                pl.BlockSpec((b * in_h, in_w), lambda i: (i, 0)),     # plane slab
            ],
            out_specs=pl.BlockSpec((b * out_h, out_w), lambda i: (i, 0)),
            scratch_shapes=scratch,
        ),
        compiler_params=pltpu.CompilerParams(
            dimension_semantics=("parallel",),
            vmem_limit_bytes=vmem_limit),
    )(w_h, w_w_t, slab)

    return out_slab.reshape(p, out_h, out_w)


def pallas_bilinear_resize(x: jnp.ndarray, size, max_size=None) -> jnp.ndarray:
    """x: (..., H, W) array -> (..., out_h, out_w)."""
    *lead, in_h, in_w = x.shape
    p = int(math.prod(lead)) if lead else 1
    out = _resize_planes(x.reshape(p, in_h, in_w), size, max_size)
    return out.reshape(tuple(lead) + out.shape[-2:])


class Resize:
    """JAX/Pallas equivalent of the torchvision Resize transform (bilinear)."""

    def __init__(self, size, interpolation="bilinear", max_size=None,
                 antialias=None):
        mode = getattr(interpolation, "value", interpolation)
        if mode != "bilinear":
            raise NotImplementedError(
                "Only bilinear interpolation is implemented in the Pallas port")
        # TODO(synk): antialias (torchvision's antialiased downsampling) is not
        # implemented; results match antialias=False semantics.
        self.size = size
        self.max_size = max_size
        self.interpolation = mode
        self.antialias = antialias

    def __call__(self, data_dict):
        if not data_dict:
            return {}
        # Group tensors sharing (H, W, dtype) into a single pallas_call to
        # amortize launch / weight-DMA / pipeline prologue cost.
        groups = {}
        for k, v in data_dict.items():
            sig = (int(v.shape[-2]), int(v.shape[-1]), jnp.dtype(v.dtype).name)
            groups.setdefault(sig, []).append((k, v))
        out = {}
        for (in_h, in_w, _), items in groups.items():
            stacks, counts, leads = [], [], []
            for _, v in items:
                lead = tuple(v.shape[:-2])
                cnt = int(math.prod(lead)) if lead else 1
                stacks.append(v.reshape(cnt, in_h, in_w))
                counts.append(cnt)
                leads.append(lead)
            planes = stacks[0] if len(stacks) == 1 else jnp.concatenate(stacks, 0)
            resized = _resize_planes(planes, self.size, self.max_size)
            oh, ow = int(resized.shape[-2]), int(resized.shape[-1])
            off = 0
            for (k, _), cnt, lead in zip(items, counts, leads):
                out[k] = resized[off:off + cnt].reshape(lead + (oh, ow))
                off += cnt
        return out

    def __repr__(self):
        return (self.__class__.__name__ +
                '(size={0}, interpolation={1}, max_size={2}, antialias={3})'
                .format(self.size, self.interpolation, self.max_size,
                        self.antialias))


# ----------------------------------------------------------------------------
# Pure-JAX reference (gather-based) with identical PyTorch bilinear semantics.
# ----------------------------------------------------------------------------
def _ref_resize(x, size, max_size=None):
    in_h, in_w = x.shape[-2], x.shape[-1]
    out_h, out_w = _compute_output_size(in_h, in_w, size, max_size)

    def axis_params(in_size, out_size):
        scale = in_size / out_size
        src = (jnp.arange(out_size, dtype=jnp.float32) + 0.5) * scale - 0.5
        src = jnp.clip(src, 0.0, float(in_size - 1))
        i0 = jnp.floor(src).astype(jnp.int32)
        i1 = jnp.minimum(i0 + 1, in_size - 1)
        w1 = src - i0.astype(jnp.float32)
        return i0, i1, w1

    h0, h1, wh1 = axis_params(in_h, out_h)
    w0, w1, ww1 = axis_params(in_w, out_w)

    xf = x.astype(jnp.float32)
    top = jnp.take(xf, h0, axis=-2)
    bot = jnp.take(xf, h1, axis=-2)
    rows = top * (1.0 - wh1)[:, None] + bot * wh1[:, None]
    left = jnp.take(rows, w0, axis=-1)
    right = jnp.take(rows, w1, axis=-1)
    out = left * (1.0 - ww1) + right * ww1
    if jnp.issubdtype(x.dtype, jnp.integer):
        info = jnp.iinfo(x.dtype)
        out = jnp.clip(jnp.floor(out + 0.5), info.min, info.max)
    return out.astype(x.dtype)


if __name__ == "__main__":
    key = jax.random.PRNGKey(0)
    k1, k2, k3, k4 = jax.random.split(key, 4)
    x = jax.random.normal(k1, (2, 4, 16, 16), dtype=jnp.float32)
    y = jax.random.normal(k2, (2, 3, 16, 16), dtype=jnp.float32)

    # Upsample, dict of two tensors sharing (H, W, dtype) -> single fused call.
    resize = Resize(size=(24, 24), interpolation="bilinear")
    out_dict = resize({"x": x, "y": y})
    out_x = jax.block_until_ready(out_dict["x"])
    out_y = jax.block_until_ready(out_dict["y"])
    assert out_x.shape == (2, 4, 24, 24), out_x.shape
    assert out_y.shape == (2, 3, 24, 24), out_y.shape
    for got, inp in ((out_x, x), (out_y, y)):
        ref = _ref_resize(inp, (24, 24))
        if not jnp.allclose(got, ref, atol=5e-4, rtol=5e-4):
            raise AssertionError("Pallas resize mismatch (upsample, fused dict)")

    # Asymmetric resize (tall output, narrow width).
    out2 = jax.block_until_ready(Resize(size=(64, 8))({"x": x})["x"])
    assert out2.shape == (2, 4, 64, 8), out2.shape
    ref2 = _ref_resize(x, (64, 8))
    if not jnp.allclose(out2, ref2, atol=5e-4, rtol=5e-4):
        raise AssertionError("Pallas resize mismatch (asymmetric)")

    # Tall input downsampled in H -- exercises the H-contraction-first order.
    z = jax.random.normal(k3, (2, 4, 64, 16), dtype=jnp.float32)
    out3 = jax.block_until_ready(Resize(size=(8, 24))({"z": z})["z"])
    assert out3.shape == (2, 4, 8, 24), out3.shape
    ref3 = _ref_resize(z, (8, 24))
    if not jnp.allclose(out3, ref3, atol=5e-4, rtol=5e-4):
        raise AssertionError("Pallas resize mismatch (H-downsample)")

    # uint8 input (torchvision's common case): upcast/round/clip in the kernel.
    u = jax.random.randint(k4, (2, 3, 16, 16), 0, 256, dtype=jnp.int32)
    u = u.astype(jnp.uint8)
    out4 = jax.block_until_ready(Resize(size=(24, 24))({"u": u})["u"])
    assert out4.shape == (2, 3, 24, 24), out4.shape
    assert out4.dtype == jnp.uint8, out4.dtype
    ref4 = _ref_resize(u, (24, 24))
    diff = jnp.abs(out4.astype(jnp.int32) - ref4.astype(jnp.int32))
    if int(diff.max()) > 1:   # allow 1 LSB for matmul-vs-lerp rounding ties
        raise AssertionError("Pallas resize mismatch (uint8)")

    print("KERNEL_OK")
</pallas_src>

<mosaic_0001>
module attributes {stable_mosaic.version = 11 : i64} {
  func.func @_resize_kernel_w_first(%arg0: i32, %arg1: memref<24x16xf32, #tpu.memory_space<vmem>>, %arg2: memref<16x24xf32, #tpu.memory_space<vmem>>, %arg3: memref<112x16xf32, #tpu.memory_space<vmem>>, %arg4: memref<168x24xf32, #tpu.memory_space<vmem>>, %arg5: memref<112x24xf32, #tpu.memory_space<vmem>>) attributes {dimension_semantics = [#tpu.dimension_semantics<parallel>], iteration_bounds = array<i64: 2>, scalar_prefetch = 0 : i64, scratch_operands = 1 : i64, tpu.core_type = #tpu.core_type<tc>, window_params = [{pipeline_mode = #tpu.pipeline_mode<synchronous>, transform_indices = @transform_0, window_bounds = array<i64: 24, 16>}, {pipeline_mode = #tpu.pipeline_mode<synchronous>, transform_indices = @transform_1, window_bounds = array<i64: 16, 24>}, {transform_indices = @transform_2, window_bounds = array<i64: 112, 16>}, {transform_indices = @transform_3, window_bounds = array<i64: 168, 24>}]} {
    %c0 = arith.constant 0 : index
    %c0_0 = arith.constant 0 : index
    %0 = vector.load %arg3[%c0, %c0_0] : memref<112x16xf32, #tpu.memory_space<vmem>>, vector<112x16xf32>
    %c0_1 = arith.constant 0 : index
    %c0_2 = arith.constant 0 : index
    %1 = vector.load %arg2[%c0_1, %c0_2] : memref<16x24xf32, #tpu.memory_space<vmem>>, vector<16x24xf32>
    %cst = arith.constant dense<0.000000e+00> : vector<112x24xf32>
    %2 = tpu.matmul %0, %1, %cst {dimension_numbers = #tpu.dot_dimension_numbers<[1], [0], [0], [1], [0, 0, 1, 1], [], []>} : vector<112x16xf32>, vector<16x24xf32>, vector<112x24xf32> -> vector<112x24xf32>
    %c0_3 = arith.constant 0 : index
    %c0_4 = arith.constant 0 : index
    %3 = vector.load %arg5[%c0_3, %c0_4] : memref<112x24xf32, #tpu.memory_space<vmem>>, vector<112x24xf32>
    tpu.vector_store %arg5[%c0_3, %c0_4], %2 {strides = array<i32>} : memref<112x24xf32, #tpu.memory_space<vmem>>, vector<112x24xf32>,
    %c0_5 = arith.constant 0 : index
    %c0_6 = arith.constant 0 : index
    %4 = vector.load %arg1[%c0_5, %c0_6] : memref<24x16xf32, #tpu.memory_space<vmem>>, vector<24x16xf32>
    %c0_7 = arith.constant 0 : index
    %c0_8 = arith.constant 0 : index
    %5 = vector.load %arg5[%c0_7, %c0_8] : memref<112x24xf32, #tpu.memory_space<vmem>>, vector<16x24xf32>
    %cst_9 = arith.constant dense<0.000000e+00> : vector<24x24xf32>
    %6 = tpu.matmul %4, %5, %cst_9 {dimension_numbers = #tpu.dot_dimension_numbers<[1], [0], [0], [1], [0, 0, 1, 1], [], []>} : vector<24x16xf32>, vector<16x24xf32>, vector<24x24xf32> -> vector<24x24xf32>
    %c0_10 = arith.constant 0 : index
    %c0_11 = arith.constant 0 : index
    %7 = vector.load %arg4[%c0_10, %c0_11] : memref<168x24xf32, #tpu.memory_space<vmem>>, vector<24x24xf32>
    tpu.vector_store %arg4[%c0_10, %c0_11], %6 {strides = array<i32>} : memref<168x24xf32, #tpu.memory_space<vmem>>, vector<24x24xf32>,
    %c16 = arith.constant 16 : index
    %c0_12 = arith.constant 0 : index
    %8 = vector.load %arg5[%c16, %c0_12] : memref<112x24xf32, #tpu.memory_space<vmem>>, vector<16x24xf32>
    %cst_13 = arith.constant dense<0.000000e+00> : vector<24x24xf32>
    %9 = tpu.matmul %4, %8, %cst_13 {dimension_numbers = #tpu.dot_dimension_numbers<[1], [0], [0], [1], [0, 0, 1, 1], [], []>} : vector<24x16xf32>, vector<16x24xf32>, vector<24x24xf32> -> vector<24x24xf32>
    %c24 = arith.constant 24 : index
    %c0_14 = arith.constant 0 : index
    %10 = vector.load %arg4[%c24, %c0_14] : memref<168x24xf32, #tpu.memory_space<vmem>>, vector<24x24xf32>
    tpu.vector_store %arg4[%c24, %c0_14], %9 {strides = array<i32>} : memref<168x24xf32, #tpu.memory_space<vmem>>, vector<24x24xf32>,
    %c32 = arith.constant 32 : index
    %c0_15 = arith.constant 0 : index
    %11 = vector.load %arg5[%c32, %c0_15] : memref<112x24xf32, #tpu.memory_space<vmem>>, vector<16x24xf32>
    %cst_16 = arith.constant dense<0.000000e+00> : vector<24x24xf32>
    %12 = tpu.matmul %4, %11, %cst_16 {dimension_numbers = #tpu.dot_dimension_numbers<[1], [0], [0], [1], [0, 0, 1, 1], [], []>} : vector<24x16xf32>, vector<16x24xf32>, vector<24x24xf32> -> vector<24x24xf32>
    %c48 = arith.constant 48 : index
    %c0_17 = arith.constant 0 : index
    %13 = vector.load %arg4[%c48, %c0_17] : memref<168x24xf32, #tpu.memory_space<vmem>>, vector<24x24xf32>
    tpu.vector_store %arg4[%c48, %c0_17], %12 {strides = array<i32>} : memref<168x24xf32, #tpu.memory_space<vmem>>, vector<24x24xf32>,
    %c48_18 = arith.constant 48 : index
    %c0_19 = arith.constant 0 : index
    %14 = vector.load %arg5[%c48_18, %c0_19] : memref<112x24xf32, #tpu.memory_space<vmem>>, vector<16x24xf32>
    %cst_20 = arith.constant dense<0.000000e+00> : vector<24x24xf32>
    %15 = tpu.matmul %4, %14, %cst_20 {dimension_numbers = #tpu.dot_dimension_numbers<[1], [0], [0], [1], [0, 0, 1, 1], [], []>} : vector<24x16xf32>, vector<16x24xf32>, vector<24x24xf32> -> vector<24x24xf32>
    %c72 = arith.constant 72 : index
    %c0_21 = arith.constant 0 : index
    %16 = vector.load %arg4[%c72, %c0_21] : memref<168x24xf32, #tpu.memory_space<vmem>>, vector<24x24xf32>
    tpu.vector_store %arg4[%c72, %c0_21], %15 {strides = array<i32>} : memref<168x24xf32, #tpu.memory_space<vmem>>, vector<24x24xf32>,
    %c64 = arith.constant 64 : index
    %c0_22 = arith.constant 0 : index
    %17 = vector.load %arg5[%c64, %c0_22] : memref<112x24xf32, #tpu.memory_space<vmem>>, vector<16x24xf32>
    %cst_23 = arith.constant dense<0.000000e+00> : vector<24x24xf32>
    %18 = tpu.matmul %4, %17, %cst_23 {dimension_numbers = #tpu.dot_dimension_numbers<[1], [0], [0], [1], [0, 0, 1, 1], [], []>} : vector<24x16xf32>, vector<16x24xf32>, vector<24x24xf32> -> vector<24x24xf32>
    %c96 = arith.constant 96 : index
    %c0_24 = arith.constant 0 : index
    %19 = vector.load %arg4[%c96, %c0_24] : memref<168x24xf32, #tpu.memory_space<vmem>>, vector<24x24xf32>
    tpu.vector_store %arg4[%c96, %c0_24], %18 {strides = array<i32>} : memref<168x24xf32, #tpu.memory_space<vmem>>, vector<24x24xf32>,
    %c80 = arith.constant 80 : index
    %c0_25 = arith.constant 0 : index
    %20 = vector.load %arg5[%c80, %c0_25] : memref<112x24xf32, #tpu.memory_space<vmem>>, vector<16x24xf32>
    %cst_26 = arith.constant dense<0.000000e+00> : vector<24x24xf32>
    %21 = tpu.matmul %4, %20, %cst_26 {dimension_numbers = #tpu.dot_dimension_numbers<[1], [0], [0], [1], [0, 0, 1, 1], [], []>} : vector<24x16xf32>, vector<16x24xf32>, vector<24x24xf32> -> vector<24x24xf32>
    %c120 = arith.constant 120 : index
    %c0_27 = arith.constant 0 : index
    %22 = vector.load %arg4[%c120, %c0_27] : memref<168x24xf32, #tpu.memory_space<vmem>>, vector<24x24xf32>
    tpu.vector_store %arg4[%c120, %c0_27], %21 {strides = array<i32>} : memref<168x24xf32, #tpu.memory_space<vmem>>, vector<24x24xf32>,
    %c96_28 = arith.constant 96 : index
    %c0_29 = arith.constant 0 : index
    %23 = vector.load %arg5[%c96_28, %c0_29] : memref<112x24xf32, #tpu.memory_space<vmem>>, vector<16x24xf32>
    %cst_30 = arith.constant dense<0.000000e+00> : vector<24x24xf32>
    %24 = tpu.matmul %4, %23, %cst_30 {dimension_numbers = #tpu.dot_dimension_numbers<[1], [0], [0], [1], [0, 0, 1, 1], [], []>} : vector<24x16xf32>, vector<16x24xf32>, vector<24x24xf32> -> vector<24x24xf32>
    %c144 = arith.constant 144 : index
    %c0_31 = arith.constant 0 : index
    %25 = vector.load %arg4[%c144, %c0_31] : memref<168x24xf32, #tpu.memory_space<vmem>>, vector<24x24xf32>
    tpu.vector_store %arg4[%c144, %c0_31], %24 {strides = array<i32>} : memref<168x24xf32, #tpu.memory_space<vmem>>, vector<24x24xf32>,
    return
  }
  func.func @transform_0(%arg0: i32) -> (i32, i32) {
    %c0_i32 = arith.constant 0 : i32
    %c0_i32_0 = arith.constant 0 : i32
    %c0_i32_1 = arith.constant 0 : i32
    return %c0_i32, %c0_i32_0 : i32, i32
  }
  func.func @transform_1(%arg0: i32) -> (i32, i32) {
    %c0_i32 = arith.constant 0 : i32
    %c0_i32_0 = arith.constant 0 : i32
    %c0_i32_1 = arith.constant 0 : i32
    return %c0_i32, %c0_i32_0 : i32, i32
  }
  func.func @transform_2(%arg0: i32) -> (i32, i32) {
    %c0_i32 = arith.constant 0 : i32
    %c0_i32_0 = arith.constant 0 : i32
    return %arg0, %c0_i32 : i32, i32
  }
  func.func @transform_3(%arg0: i32) -> (i32, i32) {
    %c0_i32 = arith.constant 0 : i32
    %c0_i32_0 = arith.constant 0 : i32
    return %arg0, %c0_i32 : i32, i32
  }
}

</mosaic_0001>

<bundles_post_ra>
// kernel: tpu_custom_call.1
= control target key start
LH: loop header
LB: loop body
LE: loop exit
PB: predicated region body
PF: predicated region fallthrough
CT: control target
= control target key end

     0   :  { %s1326_s12 = smov 0   ;;  %s1532_s0 = inlined_call_operand.vmem [shape: f32[24,16], index: 0, kind: input, shape index: {}]   ;;  %s1533_s1 = inlined_call_operand.vmem [shape: f32[16,24], index: 1, kind: input, shape index: {}]   ;;  %s1534_s2 = inlined_call_operand.vmem [shape: f32[224,16], index: 2, kind: input, shape index: {}]   ;;  %s1535_s3 = inlined_call_operand.vmem [shape: f32[336,24], index: 3, kind: output, shape index: {}]  }
   0x1 LB: > { %s1046_s13 = sadd.s32 4294967295, %s1301_s12   ;;  %p1050_p0 = scmp.ge.s32.totalorder %s1301_s12, 1  ;;  %s1301_s12 = sphi %s1326_s12, %s13_s12  }
   0x2   : > { %p138_p1 = scmp.lt.s32.totalorder %s1301_s12, 3 }
   0x4   : > { %p139_p2 = pnand %p1050_p0, %p138_p1 }
   0x5   : > { %v188_v0 = vld [vmem:[%s1533_s1] sm:$0xff] (!%p139_p2)  ;;  %v189_v1 = vld [vmem:[%s1533_s1 + $0x8] sm:$0xff] (!%p139_p2)  ;;  %s162_s18 = smul.u32 (!%p139_p2), 14, %s1046_s13  ;;  %vm190_vm0 = vcmask (!%p139_p2), 130048   ;;  %v1303_v17 = vmov (!%p139_p2), 0.0|0.0   ;;  %vm1304_vm1 = vmmov (!%p139_p2), 0  }
   0x6   : > { %142 = sbr.rel (%p139_p2) target bundleno = 509 (0x1fd), region = 32  ;;  %v1257_v2 = vpack.c.bf16 (!%p139_p2), %v189_v1, %v188_v0  ;;  %1282 = vmatprep.subr.bf16.mxu1 (!%p139_p2), %v1303_v17  ;;  %v1305_v18 = vmov (!%p139_p2), 0.0   ;;  %vm368_vm2 = vcmask (!%p139_p2), 195584   ;;  %v1374_v28 = vld [vmem:[%s1532_s0 + $0x8] sm:$0xff] (!%p139_p2)  ;;  %v1383_v34 = vld [vmem:[%s1532_s0] sm:$0xff] (!%p139_p2)  ;;  %v1394_v35 = vld [vmem:[%s1532_s0 + $0x10] sm:$0xff] (!%p139_p2) }
   0x7   : > { %p163_p3 = scmp.lt.s32.totalorder (!%p139_p2), %s162_s18, 27  ;;  %1173 = vmatprep.mubr.msk.f32.mxu1 (!%p139_p2), %vm1304_vm1, %v1305_v18  ;;  %s168_s29 = smul.u32 (!%p139_p2), 21, %s1046_s13 }
   0x8   : > { %1258 = vmatprep.subr.bf16.mxu0 (!%p139_p2), %v1257_v2 }
   0x9   : > { %1260 = vmatpush3.bf16.msra.mxu0 (!%p139_p2), %v1257_v2  ;;  %p169_p4 = scmp.lt.s32.totalorder (!%p139_p2), %s168_s29, 41 }
   0xa   : > { %1261 = vmatprep.subr.bf16.mxu0 (!%p139_p2), %v1303_v17 }
   0xd   : > { %s1537_s18 = smov (!%p163_p3, %s162_s18), 27  ;;  %s1539_s29 = smov (!%p169_p4, %s168_s29), 41 }
   0xe   : > { %s1051_s19 = sshll.u32 %s1537_s18, 3  ;;  %s1052_s30 = sshll.u32 %s1539_s29, 3 }
   0xf   : > { %s166_s22 = scalar_lea.vmem %s1534_s2, %s1051_s19  ;;  %s1485_s6 = scalar_lea.vmem %s1535_s3, %s1052_s30 }
  0x10   : > { %v174_v3 = vld [vmem:[%s166_s22] sm:$0xff]  ;;  %v175_v4 = vld [vmem:[%s166_s22 + $0x8] sm:$0xff]  ;;  %v176_v5 = vld [vmem:[%s166_s22 + $0x10] sm:$0xff] }
  0x11   : > { %1145 = vmatprep.mubr.msk.f32.mxu0 %vm190_vm0, %v174_v3  ;;  %v177_v6 = vld [vmem:[%s166_s22 + $0x18] sm:$0xff]  ;;  %v178_v7 = vld [vmem:[%s166_s22 + $0x20] sm:$0xff]  ;;  %v179_v8 = vld [vmem:[%s166_s22 + $0x28] sm:$0xff] }
  0x12   : > { %1146 = vmatmul.mubr.msk.f32.vlgmr.msra.gmra.mrb[0].mxu0 %vm190_vm0, %v175_v4  ;;  %v180_v9 = vld [vmem:[%s166_s22 + $0x30] sm:$0xff]  ;;  %v181_v10 = vld [vmem:[%s166_s22 + $0x38] sm:$0xff]  ;;  %v182_v11 = vld [vmem:[%s166_s22 + $0x40] sm:$0xff] }
  0x13   : > { %1148 = vmatprep.mubr.msk.f32.mxu0 %vm190_vm0, %v176_v5  ;;  %v183_v12 = vld [vmem:[%s166_s22 + $0x48] sm:$0xff]  ;;  %v184_v13 = vld [vmem:[%s166_s22 + $0x50] sm:$0xff]  ;;  %v185_v14 = vld [vmem:[%s166_s22 + $0x58] sm:$0xff] }
  0x14   : > { %v186_v15 = vld [vmem:[%s166_s22 + $0x60] sm:$0xff]  ;;  %v187_v16 = vld [vmem:[%s166_s22 + $0x68] sm:$0xff] }
  0x16   : > { %1149 = vmatmul.mubr.msk.f32.gmra.mrb[2].mxu0 %vm190_vm0, %v177_v6 }
  0x17   : > { %1151 = vmatprep.mubr.msk.f32.mxu0 %vm190_vm0, %v178_v7 }
  0x1a   : > { %1152 = vmatmul.mubr.msk.f32.gmra.mrb[4].mxu0 %vm190_vm0, %v179_v8 }
  0x1b   : > { %1154 = vmatprep.mubr.msk.f32.mxu0 %vm190_vm0, %v180_v9 }
  0x1e   : > { %1155 = vmatmul.mubr.msk.f32.gmra.mrb[6].mxu0 %vm190_vm0, %v181_v10 }
  0x1f   : > { %1157 = vmatprep.mubr.msk.f32.mxu0 %vm190_vm0, %v182_v11 }
  0x22   : > { %1158 = vmatmul.mubr.msk.f32.gmra.mrb[8].mxu0 %vm190_vm0, %v183_v12 }
  0x23   : > { %1160 = vmatprep.mubr.msk.f32.mxu0 %vm190_vm0, %v184_v13 }
  0x26   : > { %1161 = vmatmul.mubr.msk.f32.gmra.mrb[10].mxu0 %vm190_vm0, %v185_v14 }
  0x27   : > { %1163 = vmatprep.mubr.msk.f32.mxu0 %vm190_vm0, %v186_v15 }
  0x2a   : > { %1164 = vmatmul.mubr.msk.f32.gmra.mrb[12].mxu0 %vm190_vm0, %v187_v16 }
  0x2b   : > { %1170 = vmatprep.mubr.msk.f32.mxu0 %vm1304_vm1, %v1305_v18 }
  0xe5   : > { %v1147_v19 = vpop.f32.mrb[0].mxu0 }
  0xe6   : > { %370 = vst.msk [vmem:[#allocation2 + $0x8] sm:$0xff] %vm368_vm2, %v1147_v19  ;;  %v299_v20 = vpop.f32.mrb[1].mxu0 }
  0xe7   : > { %369 = vst.msk [vmem:[#allocation2] sm:$0xff] %vm368_vm2, %v299_v20 }
  0xe9   : > { %v1150_v21 = vpop.f32.mrb[2].mxu0 }
  0xea   : > { %372 = vst.msk [vmem:[#allocation2 + $0x18] sm:$0xff] %vm368_vm2, %v1150_v21  ;;  %v309_v22 = vpop.f32.mrb[3].mxu0 }
  0xeb   : > { %371 = vst.msk [vmem:[#allocation2 + $0x10] sm:$0xff] %vm368_vm2, %v309_v22 }
  0xed   : > { %v1153_v23 = vpop.f32.mrb[4].mxu0  ;;  %v387_v24 = vld [vmem:[#allocation2 + $0x8] sm:$0xff] }
  0xee   : > { %374 = vst.msk [vmem:[#allocation2 + $0x28] sm:$0xff] %vm368_vm2, %v1153_v23  ;;  %v319_v25 = vpop.f32.mrb[5].mxu0  ;;  %v386_v26 = vld [vmem:[#allocation2] sm:$0xff] }
  0xef   : > { %373 = vst.msk [vmem:[#allocation2 + $0x20] sm:$0xff] %vm368_vm2, %v319_v25  ;;  %v1262_v27 = vpack.c.bf16 %v387_v24, %v386_v26 }
  0xf1   : > { %1263 = vmatpush3.bf16.msra.mxu0 %v1262_v27  ;;  %1283 = vmatpush3.bf16.msra.mxu1 %v1262_v27  ;;  %v481_v29 = vld [vmem:[#allocation2 + $0x18] sm:$0xff]  ;;  %v1156_v30 = vpop.f32.mrb[6].mxu0 }
  0xf2   : > { %1264 = vmatprep.subr.bf16.mxu1 %v1303_v17  ;;  %v480_v31 = vld [vmem:[#allocation2 + $0x10] sm:$0xff]  ;;  %376 = vst.msk [vmem:[#allocation2 + $0x38] sm:$0xff] %vm368_vm2, %v1156_v30  ;;  %v329_v32 = vpop.f32.mrb[7].mxu0  ;;  %1270 = vmatprep.subr.bf16.mxu0 %v1303_v17 }
  0xf3   : > { %v1265_v33 = vpack.c.bf16 %v481_v29, %v480_v31  ;;  %375 = vst.msk [vmem:[#allocation2 + $0x30] sm:$0xff] %vm368_vm2, %v329_v32 }
  0xf4   : > { %1174 = vmatmul.mubr.msk.f32.vlgmr.msra.gmra.mrb[0].mxu1 %vm190_vm0, %v1374_v28  ;;  %1171 = vmatmul.mubr.msk.f32.vlgmr.msra.gmra.mrb[14].mxu0 %vm190_vm0, %v1383_v34 }
  0xf5   : > { %1266 = vmatpush3.bf16.msra.mxu1 %v1265_v33  ;;  %1176 = vmatprep.mubr.msk.f32.mxu1 %vm1304_vm1, %v1305_v18  ;;  %v1159_v36 = vpop.f32.mrb[8].mxu0  ;;  %v566_v38 = vld [vmem:[#allocation2 + $0x28] sm:$0xff] }
  0xf6   : > { %1267 = vmatprep.subr.bf16.mxu1 %v1303_v17  ;;  %378 = vst.msk [vmem:[#allocation2 + $0x48] sm:$0xff] %vm368_vm2, %v1159_v36  ;;  %v565_v37 = vld [vmem:[#allocation2 + $0x20] sm:$0xff]  ;;  %v339_v39 = vpop.f32.mrb[9].mxu0  ;;  %1209 = vmatprep.mubr.msk.f32.mxu0 %vm1304_vm1, %v1305_v18 }
  0xf7   : > { %377 = vst.msk [vmem:[#allocation2 + $0x40] sm:$0xff] %vm368_vm2, %v339_v39  ;;  %v1268_v40 = vpack.c.bf16 %v566_v38, %v565_v37 }
  0xf8   : > { %1177 = vmatmul.mubr.msk.f32.gmra.mrb[2].mxu1 %vm190_vm0, %v1394_v35 }
  0xf9   : > { %1183 = vmatprep.mubr.msk.f32.mxu1 %vm1304_vm1, %v1305_v18  ;;  %v1162_v41 = vpop.f32.mrb[10].mxu0  ;;  %v651_v42 = vld [vmem:[#allocation2 + $0x38] sm:$0xff] }
  0xfa   : > { %380 = vst.msk [vmem:[#allocation2 + $0x58] sm:$0xff] %vm368_vm2, %v1162_v41  ;;  %v650_v43 = vld [vmem:[#allocation2 + $0x30] sm:$0xff]  ;;  %v349_v44 = vpop.f32.mrb[11].mxu0 }
  0xfb   : > { %v1271_v45 = vpack.c.bf16 %v651_v42, %v650_v43  ;;  %379 = vst.msk [vmem:[#allocation2 + $0x50] sm:$0xff] %vm368_vm2, %v349_v44 }
  0xfc   : > { %1184 = vmatmul.mubr.msk.f32.vlgmr.msra.gmra.mrb[4].mxu1 %vm190_vm0, %v1383_v34 }
  0xfd   : > { %1269 = vmatpush3.bf16.msra.mxu1 %v1268_v40  ;;  %1186 = vmatprep.mubr.msk.f32.mxu1 %vm1304_vm1, %v1305_v18  ;;  %v1165_v46 = vpop.f32.mrb[12].mxu0  ;;  %v736_v50 = vld [vmem:[#allocation2 + $0x48] sm:$0xff] }
  0xfe   : > { %1272 = vmatpush3.bf16.msra.mxu0 %v1271_v45  ;;  %1273 = vmatprep.subr.bf16.mxu1 %v1303_v17  ;;  %382 = vst.msk [vmem:[#allocation2 + $0x68] sm:$0xff] %vm368_vm2, %v1165_v46  ;;  %v359_v47 = vpop.f32.mrb[13].mxu0  ;;  %v735_v49 = vld [vmem:[#allocation2 + $0x40] sm:$0xff] }
  0xff   : > { %381 = vst.msk [vmem:[#allocation2 + $0x60] sm:$0xff] %vm368_vm2, %v359_v47  ;;  %1276 = vmatprep.subr.bf16.mxu0 %v1303_v17  ;;  %v1274_v53 = vpack.c.bf16 %v736_v50, %v735_v49 }
 0x100   : > { %1187 = vmatmul.mubr.msk.f32.gmra.mrb[6].mxu1 %vm190_vm0, %v1374_v28 }
 0x101   : > { %1189 = vmatprep.mubr.msk.f32.mxu1 %vm1304_vm1, %v1305_v18  ;;  %1210 = vmatmul.mubr.msk.f32.vlgmr.msra.gmra.mrb[16].mxu0 %vm190_vm0, %v1383_v34  ;;  %v821_v48 = vld [vmem:[#allocation2 + $0x58] sm:$0xff] }
 0x102   : > { %v820_v51 = vld [vmem:[#allocation2 + $0x50] sm:$0xff]  ;;  %1212 = vmatprep.mubr.msk.f32.mxu0 %vm1304_vm1, %v1305_v18 }
 0x103   : > { %v1277_v52 = vpack.c.bf16 %v821_v48, %v820_v51 }
 0x104   : > { %1190 = vmatmul.mubr.msk.f32.gmra.mrb[8].mxu1 %vm190_vm0, %v1394_v35 }
 0x105   : > { %1196 = vmatprep.mubr.msk.f32.mxu1 %vm1304_vm1, %v1305_v18  ;;  %1278 = vmatpush3.bf16.msra.mxu0 %v1277_v52  ;;  %v906_v55 = vld [vmem:[#allocation2 + $0x68] sm:$0xff] }
 0x106   : > { %1213 = vmatmul.mubr.msk.f32.gmra.mrb[18].mxu0 %vm190_vm0, %v1374_v28  ;;  %v905_v54 = vld [vmem:[#allocation2 + $0x60] sm:$0xff] }
 0x107   : > { %1215 = vmatprep.mubr.msk.f32.mxu0 %vm1304_vm1, %v1305_v18  ;;  %v1280_v56 = vpack.c.bf16 %v906_v55, %v905_v54 }
 0x108   : > { %1197 = vmatmul.mubr.msk.f32.vlgmr.msra.gmra.mrb[10].mxu1 %vm190_vm0, %v1383_v34 }
 0x109   : > { %1275 = vmatpush3.bf16.msra.mxu1 %v1274_v53  ;;  %1199 = vmatprep.mubr.msk.f32.mxu1 %vm1304_vm1, %v1305_v18 }
 0x10a   : > { %1279 = vmatprep.subr.bf16.mxu1 %v1303_v17  ;;  %1216 = vmatmul.mubr.msk.f32.gmra.mrb[20].mxu0 %vm190_vm0, %v1394_v35 }
 0x10b   : > { %1235 = vmatprep.mubr.msk.f32.mxu0 %vm1304_vm1, %v1305_v18 }
 0x10c   : > { %1200 = vmatmul.mubr.msk.f32.gmra.mrb[12].mxu1 %vm190_vm0, %v1374_v28 }
 0x10d   : > { %1202 = vmatprep.mubr.msk.f32.mxu1 %vm1304_vm1, %v1305_v18 }
 0x10e   : > { %1236 = vmatmul.mubr.msk.f32.vlgmr.msra.gmra.mrb[22].mxu0 %vm190_vm0, %v1383_v34 }
 0x10f   : > { %1238 = vmatprep.mubr.msk.f32.mxu0 %vm1304_vm1, %v1305_v18 }
 0x110   : > { %1203 = vmatmul.mubr.msk.f32.gmra.mrb[14].mxu1 %vm190_vm0, %v1394_v35 }
 0x111   : > { %1222 = vmatprep.mubr.msk.f32.mxu1 %vm1304_vm1, %v1305_v18 }
 0x112   : > { %1239 = vmatmul.mubr.msk.f32.gmra.mrb[24].mxu0 %vm190_vm0, %v1374_v28 }
 0x113   : > { %1241 = vmatprep.mubr.msk.f32.mxu0 %vm1304_vm1, %v1305_v18 }
 0x114   : > { %1223 = vmatmul.mubr.msk.f32.vlgmr.msra.gmra.mrb[16].mxu1 %vm190_vm0, %v1383_v34 }
 0x115   : > { %1281 = vmatpush3.bf16.msra.mxu1 %v1280_v56  ;;  %1225 = vmatprep.mubr.msk.f32.mxu1 %vm1304_vm1, %v1305_v18 }
 0x116   : > { %1242 = vmatmul.mubr.msk.f32.gmra.mrb[26].mxu0 %vm190_vm0, %v1394_v35 }
 0x118   : > { %1226 = vmatmul.mubr.msk.f32.gmra.mrb[18].mxu1 %vm190_vm0, %v1374_v28 }
 0x119   : > { %1228 = vmatprep.mubr.msk.f32.mxu1 %vm1304_vm1, %v1305_v18 }
 0x11c   : > { %1229 = vmatmul.mubr.msk.f32.gmra.mrb[20].mxu1 %vm190_vm0, %v1394_v35 }
 0x11d   : > { %1248 = vmatprep.mubr.msk.f32.mxu1 %vm1304_vm1, %v1305_v18 }
 0x120   : > { %1249 = vmatmul.mubr.msk.f32.vlgmr.msra.gmra.mrb[22].mxu1 %vm190_vm0, %v1383_v34 }
 0x121   : > { %1251 = vmatprep.mubr.msk.f32.mxu1 %vm1304_vm1, %v1305_v18 }
 0x124   : > { %1252 = vmatmul.mubr.msk.f32.gmra.mrb[24].mxu1 %vm190_vm0, %v1374_v28 }
 0x125   : > { %1254 = vmatprep.mubr.msk.f32.mxu1 %vm1304_vm1, %v1305_v18 }
 0x128   : > { %1255 = vmatmul.mubr.msk.f32.gmra.mrb[26].mxu1 %vm190_vm0, %v1394_v35 }
 0x1c7   : > { %v468_v57 = vpop.f32.mrb[0].mxu1  ;;  %v463_v58 = vpop.f32.mrb[14].mxu0 }
 0x1c8   : > { %478 = vst.msk [vmem:[%s1485_s6 + $0x8] sm:$0xff] %vm368_vm2, %v468_v57  ;;  %v1175_v59 = vpop.f32.mrb[1].mxu1  ;;  %477 = vst.msk [vmem:[%s1485_s6] sm:$0xff] %vm368_vm2, %v463_v58  ;;  %v1172_v60 = vpop.f32.mrb[15].mxu0 }
 0x1cb   : > { %v473_v61 = vpop.f32.mrb[2].mxu1 }
 0x1cc   : > { %479 = vst.msk [vmem:[%s1485_s6 + $0x10] sm:$0xff] %vm368_vm2, %v473_v61  ;;  %v1178_v62 = vpop.f32.mrb[3].mxu1 }
 0x1cf   : > { %v548_v63 = vpop.f32.mrb[4].mxu1 }
 0x1d0   : > { %562 = vst.msk [vmem:[%s1485_s6 + $0x18] sm:$0xff] %vm368_vm2, %v548_v63  ;;  %v1185_v0 = vpop.f32.mrb[5].mxu1 }
 0x1d3   : > { %v553_v1 = vpop.f32.mrb[6].mxu1 }
 0x1d4   : > { %563 = vst.msk [vmem:[%s1485_s6 + $0x20] sm:$0xff] %vm368_vm2, %v553_v1  ;;  %v1188_v2 = vpop.f32.mrb[7].mxu1  ;;  %v718_v3 = vpop.f32.mrb[16].mxu0 }
 0x1d5   : > { %732 = vst.msk [vmem:[%s1485_s6 + $0x48] sm:$0xff] %vm368_vm2, %v718_v3  ;;  %v1211_v4 = vpop.f32.mrb[17].mxu0 }
 0x1d7   : > { %v558_v5 = vpop.f32.mrb[8].mxu1 }
 0x1d8   : > { %564 = vst.msk [vmem:[%s1485_s6 + $0x28] sm:$0xff] %vm368_vm2, %v558_v5  ;;  %v1191_v6 = vpop.f32.mrb[9].mxu1 }
 0x1d9   : > { %v723_v7 = vpop.f32.mrb[18].mxu0 }
 0x1da   : > { %733 = vst.msk [vmem:[%s1485_s6 + $0x50] sm:$0xff] %vm368_vm2, %v723_v7  ;;  %v1214_v8 = vpop.f32.mrb[19].mxu0 }
 0x1db   : > { %v633_v9 = vpop.f32.mrb[10].mxu1 }
 0x1dc   : > { %647 = vst.msk [vmem:[%s1485_s6 + $0x30] sm:$0xff] %vm368_vm2, %v633_v9  ;;  %v1198_v10 = vpop.f32.mrb[11].mxu1 }
 0x1dd   : > { %v728_v11 = vpop.f32.mrb[20].mxu0 }
 0x1de   : > { %734 = vst.msk [vmem:[%s1485_s6 + $0x58] sm:$0xff] %vm368_vm2, %v728_v11  ;;  %v1217_v12 = vpop.f32.mrb[21].mxu0 }
 0x1df   : > { %v638_v13 = vpop.f32.mrb[12].mxu1 }
 0x1e0   : > { %648 = vst.msk [vmem:[%s1485_s6 + $0x38] sm:$0xff] %vm368_vm2, %v638_v13  ;;  %v1201_v14 = vpop.f32.mrb[13].mxu1 }
 0x1e1   : > { %v888_v15 = vpop.f32.mrb[22].mxu0 }
 0x1e2   : > { %902 = vst.msk [vmem:[%s1485_s6 + $0x78] sm:$0xff] %vm368_vm2, %v888_v15  ;;  %v1237_v16 = vpop.f32.mrb[23].mxu0 }
 0x1e3   : > { %v643_v17 = vpop.f32.mrb[14].mxu1 }
 0x1e4   : > { %649 = vst.msk [vmem:[%s1485_s6 + $0x40] sm:$0xff] %vm368_vm2, %v643_v17  ;;  %v1204_v18 = vpop.f32.mrb[15].mxu1 }
 0x1e5   : > { %v893_v19 = vpop.f32.mrb[24].mxu0 }
 0x1e6   : > { %903 = vst.msk [vmem:[%s1485_s6 + $0x80] sm:$0xff] %vm368_vm2, %v893_v19  ;;  %v1240_v20 = vpop.f32.mrb[25].mxu0 }
 0x1e7   : > { %v803_v21 = vpop.f32.mrb[16].mxu1 }
 0x1e8   : > { %817 = vst.msk [vmem:[%s1485_s6 + $0x60] sm:$0xff] %vm368_vm2, %v803_v21  ;;  %v1224_v22 = vpop.f32.mrb[17].mxu1 }
 0x1e9   : > { %v898_v23 = vpop.f32.mrb[26].mxu0 }
 0x1ea   : > { %904 = vst.msk [vmem:[%s1485_s6 + $0x88] sm:$0xff] %vm368_vm2, %v898_v23  ;;  %v1243_v24 = vpop.f32.mrb[27].mxu0 }
 0x1eb   : > { %v808_v25 = vpop.f32.mrb[18].mxu1 }
 0x1ec   : > { %818 = vst.msk [vmem:[%s1485_s6 + $0x68] sm:$0xff] %vm368_vm2, %v808_v25  ;;  %v1227_v26 = vpop.f32.mrb[19].mxu1 }
 0x1ef   : > { %v813_v27 = vpop.f32.mrb[20].mxu1 }
 0x1f0   : > { %819 = vst.msk [vmem:[%s1485_s6 + $0x70] sm:$0xff] %vm368_vm2, %v813_v27  ;;  %v1230_v28 = vpop.f32.mrb[21].mxu1 }
 0x1f3   : > { %v973_v29 = vpop.f32.mrb[22].mxu1 }
 0x1f4   : > { %987 = vst.msk [vmem:[%s1485_s6 + $0x90] sm:$0xff] %vm368_vm2, %v973_v29  ;;  %v1250_v30 = vpop.f32.mrb[23].mxu1 }
 0x1f7   : > { %v978_v31 = vpop.f32.mrb[24].mxu1 }
 0x1f8   : > { %988 = vst.msk [vmem:[%s1485_s6 + $0x98] sm:$0xff] %vm368_vm2, %v978_v31  ;;  %v1253_v32 = vpop.f32.mrb[25].mxu1 }
 0x1fb   : > { %v983_v33 = vpop.f32.mrb[26].mxu1 }
 0x1fc   : > { %989 = vst.msk [vmem:[%s1485_s6 + $0xa0] sm:$0xff] %vm368_vm2, %v983_v33  ;;  %v1256_v34 = vpop.f32.mrb[27].mxu1 }
 0x1fd PF: > { %s13_s12 = sadd.s32 1, %s1301_s12  }
 0x1fe   : > { %p10_p5 = scmp.ge.s32.totalorder %s13_s12, 4  }
 0x200   :  { %12 = sbr.rel (!%p10_p5) target bundleno = 1 (0x1), region = 62 }

</bundles_post_ra>
